<compile_context>
chip_gen: v7x
topology: tpu7x:2x2x1
jax: 0.10.0
libtpu: 0.0.40
codegen_flags: <defaults>
</compile_context>

<pallas_src>
from functools import partial

import jax
import jax.numpy as jnp
from jax.experimental import pallas as pl
from jax.experimental.pallas import tpu as pltpu


def _round_up(x, m):
    return ((x + m - 1) // m) * m


def _cdiv(a, b):
    return -(-a // b)


# ---------------------------------------------------------------------------
# Core Pallas kernel: stride-1 "valid" Conv1d, K taps folded into one matmul
# ---------------------------------------------------------------------------
def _conv1d_s1_kernel(xc_ref, xn_ref, w_ref, b_ref, o_ref, *, K, tile_l):
    # xc_ref: (1, Cin_p, tile_l)   current L tile of the zero-padded input
    # xn_ref: (1, Cin_p, tile_l)   next L tile (halo source)
    # w_ref : (Cout_p, K*Cin_p)    im2col-folded weight (resident for whole grid)
    # b_ref : (Cout_p, 1)
    # o_ref : (1, Cout_p, tile_l)  lane-dense output tile
    if K == 1:
        x_col = xc_ref[0]
    else:
        # 2*tile_l lane-aligned window; static slices only (no dynamic lane reads)
        xwin = jnp.concatenate([xc_ref[0], xn_ref[0]], axis=-1)
        x_col = jnp.concatenate([xwin[:, k:k + tile_l] for k in range(K)],
                                axis=0)                      # (K*Cin_p, tile_l)
    acc = jnp.dot(w_ref[...], x_col, preferred_element_type=jnp.float32)
    o_ref[0] = (acc + b_ref[...]).astype(o_ref.dtype)


def conv1d_pallas(x, weight, bias, *, compute_dtype=None, tile_l=None):
    """out[b,co,j] = bias[co] + sum_{c,k} weight[co,c,k]*x[b,c,j+k]  (stride 1, valid)."""
    B, Cin, Lin = x.shape
    Cout, Cin_w, K = weight.shape
    assert Cin_w == Cin
    Lout = Lin - K + 1
    assert Lout >= 1

    out_dtype = x.dtype
    if compute_dtype is not None:            # e.g. jnp.bfloat16 on v6e/v7x
        x = x.astype(compute_dtype)
        weight = weight.astype(compute_dtype)

    esize = jnp.dtype(x.dtype).itemsize
    osize = jnp.dtype(out_dtype).itemsize
    cin_p = _round_up(Cin, max(8, 32 // esize))      # sublane-aligned channels
    cout_p = _round_up(Cout, max(8, 32 // osize))    # sublane-aligned out channels

    if tile_l is None:
        tile_l = min(512, _round_up(Lout, 128))      # lane-dense output tiles
    tile_l = max(tile_l, _round_up(max(K - 1, 1), 128))   # halo fits in one tile
    n_l = _cdiv(Lout, tile_l)
    lout_p = n_l * tile_l
    lin_p = (n_l + 1) * tile_l                       # +1 tile for the halo spec

    xp = jnp.pad(x, ((0, 0), (0, cin_p - Cin), (0, lin_p - Lin)))
    wp = jnp.pad(weight, ((0, cout_p - Cout), (0, cin_p - Cin), (0, 0)))
    # fold K into the contraction: w2[co, k*cin_p + c] = weight[co, c, k]
    w2 = jnp.transpose(wp, (0, 2, 1)).reshape(cout_p, K * cin_p)
    b2 = jnp.pad(bias.astype(jnp.float32), (0, cout_p - Cout)).reshape(cout_p, 1)

    # explicit VMEM budget (v7x-safe cap at 64 MiB)
    raw = (4 * cin_p * tile_l * esize                # 2 input specs, double-buffered
           + 2 * cout_p * tile_l * osize             # output, double-buffered
           + 2 * cout_p * K * cin_p * esize          # resident weight
           + (K + 2) * cin_p * tile_l * esize)       # im2col / window temporaries
    vmem_limit = int(min(64 * 1024 * 1024, max(16 * 1024 * 1024, 2 * raw)))

    out = pl.pallas_call(
        partial(_conv1d_s1_kernel, K=K, tile_l=tile_l),
        out_shape=jax.ShapeDtypeStruct((B, cout_p, lout_p), out_dtype),
        grid_spec=pltpu.PrefetchScalarGridSpec(
            num_scalar_prefetch=0,
            grid=(B, n_l),
            in_specs=[
                pl.BlockSpec((1, cin_p, tile_l), lambda b, l: (b, 0, l)),
                pl.BlockSpec((1, cin_p, tile_l), lambda b, l: (b, 0, l + 1)),
                pl.BlockSpec((cout_p, K * cin_p), lambda b, l: (0, 0)),
                pl.BlockSpec((cout_p, 1), lambda b, l: (0, 0)),
            ],
            out_specs=pl.BlockSpec((1, cout_p, tile_l), lambda b, l: (b, 0, l)),
        ),
        compiler_params=pltpu.CompilerParams(
            dimension_semantics=("parallel", "parallel"),
            vmem_limit_bytes=vmem_limit,
        ),
    )(xp, xp, w2, b2)
    return out[:, :Cout, :Lout]


# ---------------------------------------------------------------------------
# Polyphase helper: run P output-phase convs as ONE Pallas conv (phases stacked
# along Cout), interleave phases in the wrapper.
#   out[b,co,P*q+r] = bias[co] + sum_{c,t} phase_w[r][co,c,t]*x_ext[b,c,q+off[r]+t]
# where x_ext is x zero-extended outside [0, L).
# ---------------------------------------------------------------------------
def _phase_conv(x, phase_w, phase_off, bias, out_len, *, compute_dtype=None):
    P = len(phase_w)
    B, Cin, L = x.shape
    Cout = phase_w[0].shape[0]
    off_min = min(phase_off)
    Kp = max(w.shape[-1] + (o - off_min) for w, o in zip(phase_w, phase_off))

    stacked = []
    for w, o in zip(phase_w, phase_off):
        sh = o - off_min
        stacked.append(jnp.pad(w, ((0, 0), (0, 0), (sh, Kp - sh - w.shape[-1]))))
    w_stack = jnp.concatenate(stacked, axis=0)               # (P*Cout, Cin, Kp)
    b_stack = jnp.tile(bias, P)

    Lq = _cdiv(out_len, P)
    need = Lq + Kp - 1
    left = max(0, -off_min)
    start = max(0, off_min)
    xs = jnp.pad(x, ((0, 0), (0, 0), (left, 0)))[:, :, start:]
    cur = xs.shape[-1]
    if cur < need:
        xs = jnp.pad(xs, ((0, 0), (0, 0), (0, need - cur)))
    elif cur > need:
        xs = xs[:, :, :need]

    ph = conv1d_pallas(xs, w_stack, b_stack, compute_dtype=compute_dtype)[:, :, :Lq]
    out = ph.reshape(B, P, Cout, Lq).transpose(0, 2, 3, 1).reshape(B, Cout, Lq * P)
    return out[:, :, :out_len]


# ---------------------------------------------------------------------------
# Strided conv on an already zero-padded input, run as a stride-1 Pallas conv
# by de-interleaving the input's stride phases into the channel dim.
# ---------------------------------------------------------------------------
def _strided_conv_input_phases(xpad, weight, bias, stride, *, compute_dtype=None):
    B, Cin, Lp = xpad.shape
    Cout, _, K = weight.shape
    s = stride
    Lout = (Lp - K) // s + 1
    assert Lout >= 1
    Kq = _cdiv(K, s)
    wp = jnp.pad(weight, ((0, 0), (0, 0), (0, s * Kq - K)))
    # w_ph[co, c*s+u, t] = weight[co, c, s*t+u]
    w_ph = jnp.transpose(wp.reshape(Cout, Cin, Kq, s), (0, 1, 3, 2)).reshape(
        Cout, Cin * s, Kq)
    L_use = s * (Lout + Kq - 1)
    if Lp < L_use:
        xpad = jnp.pad(xpad, ((0, 0), (0, 0), (0, L_use - Lp)))
    else:
        xpad = xpad[:, :, :L_use]
    # x_ph[b, c*s+u, m] = xpad[b, c, s*m+u]
    x_ph = jnp.transpose(xpad.reshape(B, Cin, L_use // s, s), (0, 1, 3, 2)).reshape(
        B, Cin * s, L_use // s)
    out = conv1d_pallas(x_ph, w_ph, bias, compute_dtype=compute_dtype)
    return out[:, :, :Lout]


# ---------------------------------------------------------------------------
# Module port
# ---------------------------------------------------------------------------
class Transpose1dLayerMultiInput:
    """JAX/Pallas port of Transpose1dLayer_multi_input (forward pass only)."""

    def __init__(self, in_channels, out_channels, kernel_size, stride,
                 padding=11, upsample=None, output_padding=1, *, key,
                 compute_dtype=None):
        self.in_channels = in_channels
        self.out_channels = out_channels
        self.kernel_size = kernel_size
        self.stride = stride
        self.padding = padding
        self.upsample = upsample
        self.output_padding = output_padding
        self.reflection_pad = kernel_size // 2       # ConstantPad1d(value=0) width
        self.compute_dtype = compute_dtype           # e.g. jnp.bfloat16 on v6e/v7x

        k1, k2, k3, k4 = jax.random.split(key, 4)
        bound = 1.0 / float(in_channels * kernel_size) ** 0.5
        self.conv_w = jax.random.uniform(
            k1, (out_channels, in_channels, kernel_size), jnp.float32, -bound, bound)
        self.conv_b = jax.random.uniform(
            k2, (out_channels,), jnp.float32, -bound, bound)
        bound_t = 1.0 / float(out_channels * kernel_size) ** 0.5
        self.tconv_w = jax.random.uniform(
            k3, (in_channels, out_channels, kernel_size), jnp.float32, -bound_t, bound_t)
        self.tconv_b = jax.random.uniform(
            k4, (out_channels,), jnp.float32, -bound_t, bound_t)

    # -- upsample branch: cat -> nearest-upsample -> ConstantPad1d -> Conv1d --
    def _forward_upsample(self, x, in_feature):
        # TODO(synk): non-integer nn.Upsample scale factors are not supported.
        up = int(self.upsample)
        xin = jnp.concatenate((x, in_feature), axis=1)
        B, Cin, L = xin.shape
        K, s, p = self.kernel_size, self.stride, self.reflection_pad
        out_len = (L * up + 2 * p - K) // s + 1
        if s == 1:
            # Fold the nearest-upsample into the conv: per output phase r, taps
            # hitting the same source sample are pre-summed, so the Pallas kernel
            # reads the ORIGINAL (un-upsampled) x.
            phase_w, phase_off = [], []
            for r in range(up):
                d = [(r + k - p) // up for k in range(K)]   # source offsets (floor)
                d0, kr = d[0], d[-1] - d[0] + 1
                wr = jnp.zeros((self.out_channels, Cin, kr), self.conv_w.dtype)
                for k in range(K):
                    wr = wr.at[:, :, d[k] - d0].add(self.conv_w[:, :, k])
                phase_w.append(wr)
                phase_off.append(d0)
            return _phase_conv(xin, phase_w, phase_off, self.conv_b, out_len,
                               compute_dtype=self.compute_dtype)
        # stride > 1 with upsample: materialize the nearest-upsample, then
        # de-interleave stride phases into channels so the kernel stays stride-1.
        x_up = jnp.repeat(xin, up, axis=-1)
        xpad = jnp.pad(x_up, ((0, 0), (0, 0), (p, p)))
        return _strided_conv_input_phases(xpad, self.conv_w, self.conv_b, s,
                                          compute_dtype=self.compute_dtype)

    # -- non-upsample branch: ConvTranspose1d as a polyphase stride-1 conv ----
    def _forward_transpose(self, x):
        B, Cin, L = x.shape
        K, s = self.kernel_size, self.stride
        pad_l = K - 1 - self.padding
        out_len = (L - 1) * s - 2 * self.padding + K + self.output_padding
        # equivalent forward-conv weight: W'[co,c,k] = tconv_w[c,co,K-1-k]
        w_eq = jnp.transpose(jnp.flip(self.tconv_w, axis=-1), (1, 0, 2))
        phase_w, phase_off = [], []
        for r in range(s):
            k0 = (pad_l - r) % s
            if k0 >= K:                       # degenerate phase (stride > K): bias only
                phase_w.append(jnp.zeros((self.out_channels, Cin, 1), w_eq.dtype))
                phase_off.append(0)
                continue
            phase_w.append(w_eq[:, :, k0::s])
            phase_off.append((r + k0 - pad_l) // s)
        return _phase_conv(x, phase_w, phase_off, self.tconv_b, out_len,
                           compute_dtype=self.compute_dtype)

    def __call__(self, x, in_feature):
        if self.upsample:
            return self._forward_upsample(x, in_feature)
        return self._forward_transpose(x)


# ---------------------------------------------------------------------------
# Pure-JAX (XLA conv) references for verification
# ---------------------------------------------------------------------------
def _ref_upsample_branch(m, x, feat):
    xin = jnp.concatenate((x, feat), axis=1)
    xin = jnp.repeat(xin, int(m.upsample), axis=-1)
    p = m.reflection_pad
    out = jax.lax.conv_general_dilated(
        xin, m.conv_w, window_strides=(m.stride,), padding=[(p, p)],
        dimension_numbers=("NCH", "OIH", "NCH"))
    return out + m.conv_b[None, :, None]


def _ref_transpose_branch(m, x):
    K, s = m.kernel_size, m.stride
    pad_l = K - 1 - m.padding
    pad_r = K - 1 - m.padding + m.output_padding
    w_eq = jnp.transpose(jnp.flip(m.tconv_w, axis=-1), (1, 0, 2))
    out = jax.lax.conv_general_dilated(
        x, w_eq, window_strides=(1,), padding=[(pad_l, pad_r)],
        lhs_dilation=(s,), dimension_numbers=("NCH", "OIH", "NCH"))
    return out + m.tconv_b[None, :, None]


# ---------------------------------------------------------------------------
if __name__ == "__main__":
    key = jax.random.PRNGKey(0)
    kx, kf, km1, km2, km3 = jax.random.split(key, 5)

    B, Cx, Cf, L = 2, 4, 4, 16
    x = jax.random.normal(kx, (B, Cx, L), jnp.float32)
    in_feature = jax.random.normal(kf, (B, Cf, L), jnp.float32)

    # 1) upsample branch (stride=1): cat -> nearest x2 -> pad -> Conv1d
    m1 = Transpose1dLayerMultiInput(Cx + Cf, 6, kernel_size=5, stride=1,
                                    padding=11, upsample=2, output_padding=1, key=km1)
    out1 = jax.block_until_ready(m1(x, in_feature))
    ref1 = _ref_upsample_branch(m1, x, in_feature)
    assert out1.shape == (B, 6, 2 * L), out1.shape
    assert bool(jnp.allclose(out1, ref1, rtol=1e-4, atol=1e-4)), \
        float(jnp.max(jnp.abs(out1 - ref1)))

    # 2) non-upsample branch: ConvTranspose1d(4, 6, 25, stride=4, pad=11, out_pad=1)
    m2 = Transpose1dLayerMultiInput(Cx, 6, kernel_size=25, stride=4,
                                    padding=11, upsample=None, output_padding=1, key=km2)
    out2 = jax.block_until_ready(m2(x, in_feature))
    ref2 = _ref_transpose_branch(m2, x)
    assert out2.shape == (B, 6, (L - 1) * 4 - 2 * 11 + 25 + 1), out2.shape
    assert bool(jnp.allclose(out2, ref2, rtol=1e-4, atol=1e-4)), \
        float(jnp.max(jnp.abs(out2 - ref2)))

    # 3) upsample branch with stride > 1 (input-phase de-interleave path)
    m3 = Transpose1dLayerMultiInput(Cx + Cf, 6, kernel_size=5, stride=2,
                                    padding=11, upsample=2, output_padding=1, key=km3)
    out3 = jax.block_until_ready(m3(x, in_feature))
    ref3 = _ref_upsample_branch(m3, x, in_feature)
    assert out3.shape == ref3.shape, (out3.shape, ref3.shape)
    assert bool(jnp.allclose(out3, ref3, rtol=1e-4, atol=1e-4)), \
        float(jnp.max(jnp.abs(out3 - ref3)))

    print("KERNEL_OK")
</pallas_src>

<mosaic_0001>
module attributes {stable_mosaic.version = 11 : i64} {
  func.func @_conv1d_s1_kernel(%arg0: i32, %arg1: i32, %arg2: memref<1x8x128xf32, #tpu.memory_space<vmem>>, %arg3: memref<1x8x128xf32, #tpu.memory_space<vmem>>, %arg4: memref<16x24xf32, #tpu.memory_space<vmem>>, %arg5: memref<16x1xf32, #tpu.memory_space<vmem>>, %arg6: memref<1x16x128xf32, #tpu.memory_space<vmem>>) attributes {dimension_semantics = [#tpu.dimension_semantics<parallel>, #tpu.dimension_semantics<parallel>], iteration_bounds = array<i64: 2, 1>, scalar_prefetch = 0 : i64, scratch_operands = 0 : i64, tpu.core_type = #tpu.core_type<tc>, window_params = [{transform_indices = @transform_0, window_bounds = array<i64: 1, 8, 128>}, {transform_indices = @transform_1, window_bounds = array<i64: 1, 8, 128>}, {pipeline_mode = #tpu.pipeline_mode<synchronous>, transform_indices = @transform_2, window_bounds = array<i64: 16, 24>}, {pipeline_mode = #tpu.pipeline_mode<synchronous>, transform_indices = @transform_3, window_bounds = array<i64: 16, 1>}, {transform_indices = @transform_4, window_bounds = array<i64: 1, 16, 128>}]} {
    %c0 = arith.constant 0 : index
    %c0_0 = arith.constant 0 : index
    %c0_1 = arith.constant 0 : index
    %0 = vector.load %arg2[%c0, %c0_0, %c0_1] : memref<1x8x128xf32, #tpu.memory_space<vmem>>, vector<1x8x128xf32>
    %1 = vector.shape_cast %0 : vector<1x8x128xf32> to vector<8x128xf32>
    %c0_2 = arith.constant 0 : index
    %c0_3 = arith.constant 0 : index
    %c0_4 = arith.constant 0 : index
    %2 = vector.load %arg3[%c0_2, %c0_3, %c0_4] : memref<1x8x128xf32, #tpu.memory_space<vmem>>, vector<1x8x128xf32>
    %3 = vector.shape_cast %2 : vector<1x8x128xf32> to vector<8x128xf32>
    %4 = tpu.concatenate %1, %3 in 1 : vector<8x128xf32>, vector<8x128xf32> -> vector<8x256xf32>
    %5 = vector.extract_strided_slice %4 {offsets = [0, 0], sizes = [8, 128], strides = [1, 1]} : vector<8x256xf32> to vector<8x128xf32>
    %6 = vector.extract_strided_slice %4 {offsets = [0, 1], sizes = [8, 128], strides = [1, 1]} : vector<8x256xf32> to vector<8x128xf32>
    %7 = vector.extract_strided_slice %4 {offsets = [0, 2], sizes = [8, 128], strides = [1, 1]} : vector<8x256xf32> to vector<8x128xf32>
    %8 = tpu.concatenate %5, %6, %7 in 0 : vector<8x128xf32>, vector<8x128xf32>, vector<8x128xf32> -> vector<24x128xf32>
    %c0_5 = arith.constant 0 : index
    %c0_6 = arith.constant 0 : index
    %9 = vector.load %arg4[%c0_5, %c0_6] : memref<16x24xf32, #tpu.memory_space<vmem>>, vector<16x24xf32>
    %cst = arith.constant dense<0.000000e+00> : vector<16x128xf32>
    %10 = tpu.matmul %9, %8, %cst {dimension_numbers = #tpu.dot_dimension_numbers<[1], [0], [0], [1], [0, 0, 1, 1], [], []>} : vector<16x24xf32>, vector<24x128xf32>, vector<16x128xf32> -> vector<16x128xf32>
    %c0_7 = arith.constant 0 : index
    %c0_8 = arith.constant 0 : index
    %11 = vector.load %arg5[%c0_7, %c0_8] : memref<16x1xf32, #tpu.memory_space<vmem>>, vector<16x1xf32>
    %12 = vector.broadcast %11 : vector<16x1xf32> to vector<16x128xf32>
    %13 = arith.addf %10, %12 : vector<16x128xf32>
    %c0_9 = arith.constant 0 : index
    %c0_10 = arith.constant 0 : index
    %c0_11 = arith.constant 0 : index
    %14 = vector.load %arg6[%c0_9, %c0_10, %c0_11] : memref<1x16x128xf32, #tpu.memory_space<vmem>>, vector<1x16x128xf32>
    %15 = vector.shape_cast %14 : vector<1x16x128xf32> to vector<16x128xf32>
    %16 = vector.shape_cast %13 : vector<16x128xf32> to vector<1x16x128xf32>
    tpu.vector_store %arg6[%c0_9, %c0_10, %c0_11], %16 {strides = array<i32>} : memref<1x16x128xf32, #tpu.memory_space<vmem>>, vector<1x16x128xf32>,
    return
  }
  func.func @transform_0(%arg0: i32, %arg1: i32) -> (i32, i32, i32) {
    %c0_i32 = arith.constant 0 : i32
    %c0_i32_0 = arith.constant 0 : i32
    return %arg0, %c0_i32, %arg1 : i32, i32, i32
  }
  func.func @transform_1(%arg0: i32, %arg1: i32) -> (i32, i32, i32) {
    %c1_i32 = arith.constant 1 : i32
    %0 = arith.addi %arg1, %c1_i32 : i32
    %c0_i32 = arith.constant 0 : i32
    %c0_i32_0 = arith.constant 0 : i32
    return %arg0, %c0_i32, %0 : i32, i32, i32
  }
  func.func @transform_2(%arg0: i32, %arg1: i32) -> (i32, i32) {
    %c0_i32 = arith.constant 0 : i32
    %c0_i32_0 = arith.constant 0 : i32
    %c0_i32_1 = arith.constant 0 : i32
    return %c0_i32, %c0_i32_0 : i32, i32
  }
  func.func @transform_3(%arg0: i32, %arg1: i32) -> (i32, i32) {
    %c0_i32 = arith.constant 0 : i32
    %c0_i32_0 = arith.constant 0 : i32
    %c0_i32_1 = arith.constant 0 : i32
    return %c0_i32, %c0_i32_0 : i32, i32
  }
  func.func @transform_4(%arg0: i32, %arg1: i32) -> (i32, i32, i32) {
    %c0_i32 = arith.constant 0 : i32
    %c0_i32_0 = arith.constant 0 : i32
    return %arg0, %c0_i32, %arg1 : i32, i32, i32
  }
}

</mosaic_0001>

<bundles_post_ra>
// kernel: tpu_custom_call.1
= control target key start
LH: loop header
LB: loop body
LE: loop exit
PB: predicated region body
PF: predicated region fallthrough
CT: control target
= control target key end

     0   :  { %9 = vsyncpa [#allocation3], 0  ;;  %s1057_s0 = inlined_call_operand.hbm [shape: f32[2,8,256], index: 0, kind: input, shape index: {}]   ;;  %s1058_s1 = inlined_call_operand.hbm [shape: f32[2,8,256], index: 1, kind: input, shape index: {}]   ;;  %s1059_s2 = inlined_call_operand.vmem [shape: f32[16,24], index: 2, kind: input, shape index: {}]   ;;  %s1060_s3 = inlined_call_operand.vmem [shape: f32[16,1], index: 3, kind: input, shape index: {}]   ;;  %s1061_s4 = inlined_call_operand.hbm [shape: f32[2,16,128], index: 4, kind: output, shape index: {}]  }
   0x1   :  { %11 = vsyncpa [#allocation3 + $0x1], 0 }
   0x2   :  { %12 = vsyncpa [#allocation6], 0 }
   0x3   :  { %14 = vsyncpa [#allocation6 + $0x1], 0 }
   0x4   :  { %15 = vsyncpa [#allocation4], 0 }
   0x5   :  { %17 = vsyncpa [#allocation4 + $0x1], 0  ;;  %s821_s15 = smov 0   ;;  %s823_s16 = smov 0  }
   0x6   :  { %s825_s17 = smov 0   ;;  %s827_s18 = smov 0  }
   0x7   :  { %s829_s19 = smov 0   ;;  %s831_s20 = smov 0  }
   0x8 LB: > { %s518_s21 = sadd.s32 4294967295, %s786_s20   ;;  %s519_s22 = sadd.s32 4294967294, %s786_s20   ;;  %s786_s20 = sphi %s831_s20, %s23_s20   ;;  %s782_s19 = sphi %s829_s19, %s1081_s19   ;;  %s778_s18 = sphi %s827_s18, %s1080_s18   ;;  %s774_s17 = sphi %s825_s17, %s1079_s17   ;;  %s770_s16 = sphi %s823_s16, %s1078_s16   ;;  %s766_s15 = sphi %s821_s15, %s1077_s15  }
   0x9   : > { %s35_s23 = sadd.s32 1, %s782_s19  ;;  %s44_s24 = sadd.s32 1, %s774_s17 }
   0xa   : > { %p37_p0 = scmp.ge.s32.totalorder %s35_s23, 2  ;;  %p51_p1 = scmp.ne.s32.totalorder %s774_s17, %s770_s16 }
   0xb   : > { %p52_p2 = scmp.eq.s32.totalorder %s786_s20, 0  ;;  %p57_p3 = scmp.ne.s32.totalorder %s770_s16, %s766_s15 }
   0xc   : > { %s1083_s23 = smov (%p37_p0, %s35_s23), 0  ;;  %p58_p5 = scmp.eq.s32.totalorder %s518_s21, 0 }
   0xd   : > { %p862_p4 = por %p52_p2, %p51_p1  ;;  %s39_s26 = ssub.s32 %s782_s19, %s1083_s23 }
   0xe   : > { %p155_p6 = scmp.eq.s32.totalorder %s518_s21, 1  ;;  %p42_p7 = scmp.eq.s32.totalorder %s39_s26, 0 }
   0xf   : > { %p868_p8 = por %p58_p5, %p57_p3  ;;  %p161_p10 = scmp.eq.s32.totalorder %s519_s22, 1 }
  0x10   : > { %p872_p9 = por %p155_p6, %p51_p1  ;;  %p577_p13 = scmp.lt.s32.totalorder %s786_s20, 2 }
  0x11   : > { %s1065_s27 = scalar_select %p868_p8, 1, 0 }
  0x12   : > { %s1066_s28 = scalar_select %p872_p9, 1, 0 }
  0x13   : > { %s877_s29 = scalar_select %p42_p7, %s774_s17, %s44_s24  }
  0x14   : > { %p879_p11 = por %p161_p10, %p57_p3  ;;  %s886_s5 = sand.u32 1, %s774_s17  }
  0x15   : > { %s522_s6 = sshll.u32 %s886_s5, 3  ;;  %s539_s7 = sshll.u32 %s782_s19, 8 }
  0x16   : > { %s1067_s30 = scalar_select %p879_p11, 1, 0 }
  0x17   : > { %s895_s10 = scalar_lea.hbm %s1057_s0, %s539_s7  ;;  %s191_s11 = scalar_lea.vmem [#allocation2], %s522_s6 }
  0x18   : > { %s200_s12 = sshll.u32 %s191_s11, 4  ;;  %p903_p0 = pnand %p577_p13, %p862_p4  ;;  %s899_s12 = int_to_ptr.vmem [resolvable:$true] %s200_s12 }
  0x19   : > { %s188_s14 = scalar_lea.sflag [#allocation3], %s886_s5  ;;  %s639_s21 = scalar_lea.hbm %s895_s10, 128 }
  0x1a   : > { %p640_p3 = scmp.ne.s32.totalorder %s895_s10, %s639_s21  ;;  %p641_p5 = pneg %p903_p0 }
  0x1b   : > { %s644_s25 = scalar_lea.hbm %s1057_s0, 512  ;;  %p645_p4 = scmp.lt.u32.totalorder %s895_s10, %s1057_s0 }
  0x1c   : > { %p642_p6 = pnand %p641_p5, %p640_p3  ;;  %p646_p10 = scmp.lt.u32.totalorder %s644_s25, %s639_s21 }
  0x1d   : > { %p648_p12 = scmp.lt.u32.totalorder %s639_s21, %s895_s10 }
  0x1e   : > { %p643_p7 = pneg %p642_p6  ;;  %p647_p13 = por %p646_p10, %p645_p4 }
  0x20   : > { %p649_p1 = por %p648_p12, %p647_p13 }
  0x22   : > { %p650_p2 = pnand %p649_p1, %p643_p7 }
  0x24   : > { %653 = shalt.err (!%p650_p2)
}
  0x25   : > { %s654_s9 = scalar_lea.vmem %s899_s12, 128  ;;  %s788_s11 = smov [#allocation2]  }
  0x26   : > { %p655_p3 = scmp.ne.s32.totalorder %s899_s12, %s654_s9  ;;  %s659_s22 = sshll.u32 %s788_s11, 4  ;;  %s660_s22 = int_to_ptr.vmem [resolvable:$false] %s659_s22 }
  0x27   : > { %s661_s24 = scalar_lea.vmem %s660_s22, 256  ;;  %p662_p9 = scmp.lt.s32.totalorder %s899_s12, %s660_s22 }
  0x28   : > { %p657_p6 = pnand %p655_p3, %p641_p5  ;;  %p663_p4 = scmp.lt.s32.totalorder %s661_s24, %s654_s9 }
  0x2a   : > { %p658_p11 = pneg %p657_p6  ;;  %p664_p10 = por %p663_p4, %p662_p9 }
  0x2c   : > { %p665_p12 = pnand %p664_p10, %p658_p11 }
  0x2e   : > { %668 = shalt.err (!%p665_p12)
}
  0x2f   : > { %569 = dma.hbm_to_vmem [thread:$0]  (!%p903_p0), %s895_s10, 128, %s899_s12, %s188_s14  }
  0x30   : > { %p1069_p1 = scmp.lt.s32.totalorder %s786_s20, 3  ;;  %p1070_p2 = scmp.ge.s32.totalorder %s786_s20, 1 }
  0x31   : > { %s450_s8 = scalar_lea.hbm %s1058_s1, %s539_s7  ;;  %s211_s9 = scalar_lea.vmem [#allocation5], %s522_s6 }
  0x32   : > { %p939_p7 = pnand %p1070_p2, %p1069_p1  ;;  %s221_s11 = sshll.u32 %s211_s9, 4  ;;  %s222_s11 = int_to_ptr.vmem [resolvable:$true] %s221_s11 }
  0x33   : > { %s950_s22 = scalar_lea.hbm %s450_s8, 128  ;;  %s208_s10 = scalar_lea.sflag [#allocation6], %s886_s5 }
  0x34   : > { %s1071_s21 = scalar_select %p939_p7, 1, 0 }
  0x35   : > { %s699_s12 = scalar_lea.hbm %s450_s8, 256  ;;  %s674_s7 = scalar_lea.hbm %s1058_s1, 512 }
  0x36   : > { %p670_p9 = scmp.ne.s32.totalorder %s950_s22, %s699_s12  ;;  %p675_p3 = scmp.lt.u32.totalorder %s950_s22, %s1058_s1 }
  0x37   : > { %p676_p6 = scmp.lt.u32.totalorder %s674_s7, %s699_s12  ;;  %p678_p10 = scmp.lt.u32.totalorder %s699_s12, %s950_s22 }
  0x38   : > { %p672_p11 = pnand %p670_p9, %p641_p5 }
  0x39   : > { %p677_p4 = por %p676_p6, %p675_p3 }
  0x3a   : > { %p673_p13 = pneg %p672_p11 }
  0x3b   : > { %p679_p12 = por %p678_p10, %p677_p4 }
  0x3d   : > { %p680_p1 = pnand %p679_p12, %p673_p13 }
  0x3f   : > { %683 = shalt.err (!%p680_p1)
}
  0x40   : > { %s684_s5 = scalar_lea.vmem %s222_s11, 128  ;;  %s789_s26 = smov [#allocation5]  }
  0x41   : > { %p685_p2 = scmp.ne.s32.totalorder %s222_s11, %s684_s5  ;;  %s689_s8 = sshll.u32 %s789_s26, 4  ;;  %s690_s8 = int_to_ptr.vmem [resolvable:$false] %s689_s8 }
  0x42   : > { %s691_s9 = scalar_lea.vmem %s690_s8, 256  ;;  %p692_p8 = scmp.lt.s32.totalorder %s222_s11, %s690_s8 }
  0x43   : > { %p687_p9 = pnand %p685_p2, %p641_p5  ;;  %p693_p7 = scmp.lt.s32.totalorder %s691_s9, %s684_s5 }
  0x45   : > { %p688_p11 = pneg %p687_p9  ;;  %p694_p3 = por %p693_p7, %p692_p8 }
  0x47   : > { %p695_p6 = pnand %p694_p3, %p688_p11 }
  0x49   : > { %698 = shalt.err (!%p695_p6)
}
  0x4a   : > { %572 = dma.hbm_to_vmem [thread:$0]  (!%p903_p0), %s950_s22, 128, %s222_s11, %s208_s10  }
  0x4b   : > { %p1072_p13 = scmp.ne.s32.totalorder %s1071_s21, 0 }
  0x4c   : > { %s974_s12 = sand.u32 (!%p1072_p13), 1, %s770_s16   ;;  %p1073_p5 = scmp.ne.s32.totalorder (!%p1072_p13), %s1065_s27, 0 }
  0x4d   : > { %230 = sbr.rel (%p1072_p13) target bundleno = 446 (0x1be), region = 36  ;;  %s529_s14 = sshll.u32 (!%p1072_p13), %s974_s12, 3 }
  0x4e   : > { %s233_s24 = scalar_lea.sflag (!%p1072_p13), [#allocation3], %s974_s12  ;;  %s236_s7 = scalar_lea.vmem (!%p1072_p13), [#allocation2], %s529_s14 }
  0x54   : > { %753 = dma.done.wait (%p1073_p5), %s233_s24, 128  }
  0x55   : > { %755 = vsyncadd (%p1073_p5), %s233_s24, 4294967168  ;;  %s242_s13 = scalar_lea.sflag [#allocation6], %s974_s12  ;;  %s245_s11 = scalar_lea.vmem [#allocation5], %s529_s14 }
  0x56   : > { %757 = dma.done.wait (%p1073_p5), %s242_s13, 128  }
  0x57   : > { %759 = vsyncadd (%p1073_p5), %s242_s13, 4294967168  ;;  %vm308_vm0 = vcmask 195584   ;;  %v276_v0 = vld [vmem:[%s236_s7] sm:$0xff]  ;;  %v277_v1 = vld [vmem:[%s245_s11] sm:$0xff]  ;;  %s790_s10 = smov 126   ;;  %v791_v4 = vmov 0  }
  0x58   : > { %v294_v2 = vld [vmem:[%s1059_s2] sm:$0xff]  ;;  %v632_v3 = vpack.i.bf16 %v277_v1, %v276_v0  ;;  %289 = vrot.lane.b32.xlu1 %v277_v1, %s790_s10  ;;  %638 = vset.pattern.permute.xlu0 %v791_v4  ;;  %s792_s27 = smov 127   ;;  %v297_v6 = vld [vmem:[%s1060_s3 + $0x8] sm:$0xff]  ;;  %vm284_vm1 = vcmask 1039360   ;;  %vm291_vm2 = vcmask 1031168   ;;  %s531_s14 = sshll.u32 %s974_s12, 4 }
  0x59   : > { %553 = vmatprep.mubr.msk.f32.mxu0 %vm308_vm0, %v294_v2  ;;  %637 = vset.pattern.permute.xlu1 %v791_v4  ;;  %v296_v5 = vld [vmem:[%s1060_s3] sm:$0xff]  ;;  %v295_v15 = vld [vmem:[%s1059_s2 + $0x8] sm:$0xff]  ;;  %s274_s24 = scalar_lea.vmem [#allocation7], %s531_s14  ;;  %s541_s13 = sshll.u32 %s778_s18, 8 }
  0x5a   : > { %633 = vrot.lane.b32.xlu0 %v632_v3, %s792_s27  ;;  %s407_s7 = sshll.u32 %s274_s24, 4  ;;  %s1008_s22 = scalar_lea.hbm %s1061_s4, %s541_s13  ;;  %s1003_s7 = int_to_ptr.vmem [resolvable:$true] %s407_s7 }
  0x5b   : > { %s700_s25 = scalar_lea.vmem %s1003_s7, 256  ;;  %p1074_p0 = scmp.ne.s32.totalorder %s1066_s28, 0 }
  0x5c   : > { %300 = vperm.xlu1 %637, %v296_v5   ;;  %p701_p8 = scmp.ne.s32.totalorder %s1003_s7, %s700_s25  ;;  %s793_s18 = smov [#allocation7]  }
  0x5d   : > { %s704_s6 = sshll.u32 %s793_s18, 4  ;;  %s705_s6 = int_to_ptr.vmem [resolvable:$false] %s704_s6 }
  0x5e   : > { %287 = vrot.lane.b32.xlu0 %v276_v0, %s790_s10  ;;  %s393_s10 = scalar_lea.sflag [#allocation4], %s974_s12  ;;  %p702_p7 = pnand %p701_p8, %p1074_p0 }
  0x5f   : > { %s706_s27 = scalar_lea.vmem %s705_s6, 512  ;;  %p707_p10 = scmp.lt.s32.totalorder %s1003_s7, %s705_s6 }
  0x60   : > { %p703_p4 = pneg %p702_p7  ;;  %p708_p12 = scmp.lt.s32.totalorder %s706_s27, %s700_s25 }
  0x62   : > { %305 = vperm.xlu0 %638, %v297_v6   ;;  %p709_p1 = por %p708_p12, %p707_p10 }
  0x64   : > { %p710_p2 = pnand %p709_p1, %p703_p4 }
  0xca   : > { %v290_v10 = vpop.permute.xlu1 %289 }
  0xcc   : > { %v634_v7 = vpop.permute.xlu0 %633 }
  0xcd   : > { %v636_v8 = vunpack.i.h.bf16 %v634_v7  ;;  %v635_v9 = vunpack.i.l.bf16 %v634_v7 }
  0xcf   : > { %v285_v11 = vsel %vm284_vm1, %v635_v9, %v636_v8 }
  0xd0   : > { %v556_v12 = vpack.c.bf16 %v285_v11, %v276_v0  ;;  %v288_v13 = vpop.permute.xlu0 %287 }
  0xd1   : > { %v292_v14 = vsel %vm291_vm2, %v288_v13, %v290_v10 }
  0xd2   : > { %557 = vmatprep.subr.bf16.mxu0 %v556_v12 }
  0xd3   : > { %559 = vmatpush3.bf16.msra.mxu0 %v556_v12 }
  0xd4   : > { %551 = vmatprep.subr.mxu0 %v292_v14 }
  0xd7   : > { %552 = vmatpush3.msra.mxu0 %v292_v14 }
  0xd8   : > { %554 = vmatmul.mubr.msk.f32.vlgmr.msra.gmra.mrb[0].mxu0 %vm308_vm0, %v295_v15 }
  0xdb   : > { %v301_v17 = vpop.permute.xlu1 %300 }
  0xe1   : > { %v306_v16 = vpop.permute.xlu0 %305 }
 0x1ab   : > { %v555_v18 = vpop.f32.mrb[0].mxu0 }
 0x1ac   : > { %v387_v19 = vadd.f32 %v555_v18, %v306_v16  ;;  %v381_v20 = vpop.f32.mrb[1].mxu0 }
 0x1ad   : > { %v382_v21 = vadd.f32 %v381_v20, %v301_v17 }
 0x1ae   : > { %391 = vst [vmem:[%s274_s24 + $0x8] sm:$0xff] %v387_v19 }
 0x1af   : > { %390 = vst [vmem:[%s274_s24] sm:$0xff] %v382_v21 }
 0x1b0   : > { %713 = shalt.err (!%p710_p2)
}
 0x1b1   : > { %s714_s5 = scalar_lea.hbm %s1008_s22, 256  ;;  %s718_s9 = scalar_lea.hbm %s1061_s4, 512 }
 0x1b2   : > { %p715_p9 = scmp.ne.s32.totalorder %s1008_s22, %s714_s5  ;;  %p719_p6 = scmp.lt.u32.totalorder %s1008_s22, %s1061_s4 }
 0x1b3   : > { %p720_p13 = scmp.lt.u32.totalorder %s718_s9, %s714_s5  ;;  %p722_p8 = scmp.lt.u32.totalorder %s714_s5, %s1008_s22 }
 0x1b4   : > { %p716_p11 = pnand %p715_p9, %p1074_p0 }
 0x1b5   : > { %p721_p5 = por %p720_p13, %p719_p6 }
 0x1b6   : > { %p717_p3 = pneg %p716_p11 }
 0x1b7   : > { %p723_p7 = por %p722_p8, %p721_p5 }
 0x1b9   : > { %p724_p4 = pnand %p723_p7, %p717_p3 }
 0x1bb   : > { %727 = shalt.err (!%p724_p4)
}
 0x1bc   : > { %s794_s13 = smov 128   ;;  %s795_s11 = smov 8  }
 0x1bd   : > { %564 = dma.vmem_to_hbm [thread:$0]  (%p1074_p0), %s1003_s7, 256, %s1008_s22, %s393_s10, %s794_s13, %s794_s13, %s795_s11  }
 0x1be PF: > { %s422_s21 = sand.u32 1, %s766_s15   ;;  %p1075_p10 = scmp.ne.s32.totalorder %s1067_s30, 0 }
 0x1bf   : > { %p1076_p12 = scmp.ge.s32.totalorder %s786_s20, 2  ;;  %s423_s25 = scalar_lea.sflag [#allocation4], %s422_s21 }
 0x1c1   : > { %p574_p1 = pnand %p1076_p12, %p1075_p10 }
 0x1c3   : > { %761 = dma.done.wait (!%p574_p1), %s423_s25, 256  }
 0x1c4   : > { %763 = vsyncadd (!%p574_p1), %s423_s25, 4294967040  ;;  %s23_s20 = sadd.s32 1, %s786_s20   ;;  %s1077_s15 = smov %s770_s16 }
 0x1c5   : > { %p20_p2 = scmp.ge.s32.totalorder %s23_s20, 4   ;;  %s1078_s16 = smov %s774_s17 }
 0x1c6   : > { %s1079_s17 = smov %s877_s29  ;;  %s1080_s18 = smov %s782_s19 }
 0x1c7   : > { %s1081_s19 = smov %s1083_s23  ;;  %22 = sbr.rel (!%p20_p2) target bundleno = 8 (0x8), region = 94 }
 0x1ce   :  { %428 = vsyncpa [#allocation3], 1 }
 0x1cf   :  { %430 = vsyncpa [#allocation3 + $0x1], 1 }
 0x1d0   :  { %431 = vsyncpa [#allocation6], 1 }
 0x1d1   :  { %433 = vsyncpa [#allocation6 + $0x1], 1 }
 0x1d2   :  { %434 = vsyncpa [#allocation4], 1 }
 0x1d3   :  { %436 = vsyncpa [#allocation4 + $0x1], 1 }

</bundles_post_ra>
